<compile_context>
chip_gen: v7x
topology: tpu7x:2x2x1
jax: 0.10.0
libtpu: 0.0.40
codegen_flags: <defaults>
</compile_context>

<pallas_src>
import jax
import jax.numpy as jnp
from jax.experimental import pallas as pl
from jax.experimental.pallas import tpu as pltpu


# ----------------------------------------------------------------------------
# Fused Pallas kernel: encoder stand-in + feature_layer MLP (transposed domain)
# ----------------------------------------------------------------------------
def _fused_kernel(x_ref, wemb_ref, bemb_ref,
                  w1_ref, b1_ref, w2_ref, b2_ref, w3_ref, b3_ref,
                  o_ref):
    """[4, T] -> [8, T] entirely in VMEM/vregs.

    Channels on sublanes, points on lanes: every dot is a plain [M,K]@[K,T]
    MXU matmul (bf16 in, f32 accumulate), every intermediate / the output is
    lane-dense (T >= 128), and the [N,128] intermediate never touches HBM.
    """
    xb = x_ref[...].astype(jnp.bfloat16)                              # [4, T]

    # encoder stand-in: 4 -> 128, ReLU   (MXU; K=4 is tiny, MXU has slack)
    h = jnp.dot(wemb_ref[...], xb, preferred_element_type=jnp.float32)
    h = jnp.maximum(h + bemb_ref[...], 0.0).astype(jnp.bfloat16)      # [128, T]

    # feature_layer: Linear(128, 64) + ReLU
    h = jnp.dot(w1_ref[...], h, preferred_element_type=jnp.float32)
    h = jnp.maximum(h + b1_ref[...], 0.0).astype(jnp.bfloat16)        # [64, T]

    # Linear(64, 32) + ReLU
    h = jnp.dot(w2_ref[...], h, preferred_element_type=jnp.float32)
    h = jnp.maximum(h + b2_ref[...], 0.0).astype(jnp.bfloat16)        # [32, T]

    # Linear(32, 8): one lane-dense f32 store per tile
    o_ref[...] = (jnp.dot(w3_ref[...], h, preferred_element_type=jnp.float32)
                  + b3_ref[...])                                       # [8, T]


# ----------------------------------------------------------------------------
# Wrapper around pallas_call
# ----------------------------------------------------------------------------
TILE_N = 2048   # points per grid step (lane axis); sweep 1024-4096 (x128)


def _choose_tile_n(n):
    """Largest tile <= TILE_N (multiple of 128 lanes) that keeps the grid >= 2
    steps when possible, so v7x's two TensorCores both get work."""
    if n >= 2 * TILE_N:
        return TILE_N
    t = -(-n // 2)                # ceil(n / 2)
    t = -(-t // 128) * 128        # round up to a lane multiple
    return max(t, 128)


def _const_spec(shape):
    # small resident parameter block: constant index map (never re-fetched)
    return pl.BlockSpec(shape, lambda i: (0,) * len(shape))


def fused_forward(pts_t, tile_n, prep):
    """pts_t: [4, Np] f32 (Np multiple of tile_n) -> [8, Np] f32."""
    cin, n = pts_t.shape
    c_out = prep["w3"].shape[0]
    grid = (n // tile_n,)
    return pl.pallas_call(
        _fused_kernel,
        out_shape=jax.ShapeDtypeStruct((c_out, n), jnp.float32),
        grid_spec=pl.GridSpec(
            grid=grid,
            in_specs=[
                pl.BlockSpec((cin, tile_n), lambda i: (0, i)),
                _const_spec(prep["w_emb"].shape), _const_spec(prep["b_emb"].shape),
                _const_spec(prep["w1"].shape), _const_spec(prep["b1"].shape),
                _const_spec(prep["w2"].shape), _const_spec(prep["b2"].shape),
                _const_spec(prep["w3"].shape), _const_spec(prep["b3"].shape),
            ],
            out_specs=pl.BlockSpec((c_out, tile_n), lambda i: (0, i)),
        ),
        compiler_params=pltpu.CompilerParams(
            dimension_semantics=("parallel",)),
    )(pts_t, prep["w_emb"], prep["b_emb"], prep["w1"], prep["b1"],
      prep["w2"], prep["b2"], prep["w3"], prep["b3"])


# ----------------------------------------------------------------------------
# Parameter init (PyTorch nn.Linear convention [out, in]) + one-time prep
# ----------------------------------------------------------------------------
def init_params(key):
    keys = jax.random.split(key, 8)

    def linear(kw, kb, fan_out, fan_in):
        bound = 1.0 / jnp.sqrt(fan_in)
        w = jax.random.uniform(kw, (fan_out, fan_in), jnp.float32, -bound, bound)
        b = jax.random.uniform(kb, (fan_out,), jnp.float32, -bound, bound)
        return w, b

    # stand-in encoder embedding: 4 -> 128
    w_emb, b_emb = linear(keys[0], keys[1], 128, 4)
    # feature_layer exactly as in the module
    w1, b1 = linear(keys[2], keys[3], 64, 128)
    w2, b2 = linear(keys[4], keys[5], 32, 64)
    w3, b3 = linear(keys[6], keys[7], 8, 32)
    return dict(w_emb=w_emb, b_emb=b_emb, w1=w1, b1=b1,
                w2=w2, b2=b2, w3=w3, b3=b3)


def prepare_params(params):
    """One-time prep (hoisted out of the forward): weights stay in their
    native [out, in] layout (natural LHS for the transposed-domain kernel)
    but are cast to bf16 for the MXU; biases become f32 columns [C, 1]."""
    bf = lambda w: w.astype(jnp.bfloat16)
    col = lambda b: b.astype(jnp.float32).reshape(-1, 1)
    return dict(
        w_emb=bf(params["w_emb"]), b_emb=col(params["b_emb"]),
        w1=bf(params["w1"]), b1=col(params["b1"]),
        w2=bf(params["w2"]), b2=col(params["b2"]),
        w3=bf(params["w3"]), b3=col(params["b3"]),
    )


# ----------------------------------------------------------------------------
# Forward pass of PTv3_deteccion
# ----------------------------------------------------------------------------
def ptv3_deteccion_forward(batch_ventanas, prep):
    """batch_ventanas: list of [Ni, 4] arrays (x, y, z, feat). Returns [N, 8]."""
    # glue: offsets + concatenation (mirrors torch.cumsum / torch.cat)
    lengths = jnp.array([v.shape[0] for v in batch_ventanas], dtype=jnp.int32)
    offset = jnp.cumsum(lengths)  # parity with the module (unused downstream)
    del offset
    pts = jnp.concatenate(batch_ventanas, axis=0).astype(jnp.float32)   # [N, 4]
    n = pts.shape[0]

    tile_n = _choose_tile_n(n)
    pad = (-n) % tile_n
    # Single fused pad+transpose relayout of the narrow [N,4] input; no
    # separate full-array pad copy.  Padded rows produce garbage (bias+ReLU)
    # and are sliced off below — nothing downstream reduces over them.
    pts_t = jnp.pad(pts, ((0, pad), (0, 0))).T                           # [4, Np]

    out_t = fused_forward(pts_t, tile_n, prep)                            # [8, Np]
    return out_t[:, :n].T                                                 # [N, 8]


# ----------------------------------------------------------------------------
# Reference (pure JAX, identical bf16 casts) for sanity check
# ----------------------------------------------------------------------------
def reference_forward(batch_ventanas, params):
    pts = jnp.concatenate(batch_ventanas, axis=0).astype(jnp.float32)

    def lin(x, w, b):
        return jnp.dot(x.astype(jnp.bfloat16), w.astype(jnp.bfloat16).T,
                       preferred_element_type=jnp.float32) + b

    h = jnp.maximum(lin(pts, params["w_emb"], params["b_emb"]), 0.0)
    h = jnp.maximum(lin(h, params["w1"], params["b1"]), 0.0)
    h = jnp.maximum(lin(h, params["w2"], params["b2"]), 0.0)
    return lin(h, params["w3"], params["b3"])


if __name__ == "__main__":
    key = jax.random.PRNGKey(0)
    k_params, k_v1, k_v2 = jax.random.split(key, 3)

    params = init_params(k_params)
    prep = prepare_params(params)       # hoisted one-time weight prep

    # two "ventanas" (point-cloud windows), each row = [x, y, z, feat]
    ventana_a = jax.random.normal(k_v1, (96, 4), jnp.float32)
    ventana_b = jax.random.normal(k_v2, (32, 4), jnp.float32)
    batch_ventanas = [ventana_a, ventana_b]

    out = ptv3_deteccion_forward(batch_ventanas, prep)
    out = jax.block_until_ready(out)

    ref = reference_forward(batch_ventanas, params)
    assert out.shape == (128, 8), out.shape
    # bf16 MXU inputs (matched in the reference) -> loosened tolerance
    assert jnp.allclose(out, ref, atol=2e-2, rtol=2e-2), "mismatch vs reference"

    print("KERNEL_OK")
</pallas_src>

<mosaic_0001>
module attributes {stable_mosaic.version = 11 : i64} {
  func.func @_fused_kernel(%arg0: i32, %arg1: memref<4x128xf32, #tpu.memory_space<vmem>>, %arg2: memref<128x4xbf16, #tpu.memory_space<vmem>>, %arg3: memref<128x1xf32, #tpu.memory_space<vmem>>, %arg4: memref<64x128xbf16, #tpu.memory_space<vmem>>, %arg5: memref<64x1xf32, #tpu.memory_space<vmem>>, %arg6: memref<32x64xbf16, #tpu.memory_space<vmem>>, %arg7: memref<32x1xf32, #tpu.memory_space<vmem>>, %arg8: memref<8x32xbf16, #tpu.memory_space<vmem>>, %arg9: memref<8x1xf32, #tpu.memory_space<vmem>>, %arg10: memref<8x128xf32, #tpu.memory_space<vmem>>) attributes {dimension_semantics = [#tpu.dimension_semantics<parallel>], iteration_bounds = array<i64: 1>, scalar_prefetch = 0 : i64, scratch_operands = 0 : i64, tpu.core_type = #tpu.core_type<tc>, window_params = [{transform_indices = @transform_0, window_bounds = array<i64: 4, 128>}, {pipeline_mode = #tpu.pipeline_mode<synchronous>, transform_indices = @transform_1, window_bounds = array<i64: 128, 4>}, {pipeline_mode = #tpu.pipeline_mode<synchronous>, transform_indices = @transform_2, window_bounds = array<i64: 128, 1>}, {pipeline_mode = #tpu.pipeline_mode<synchronous>, transform_indices = @transform_3, window_bounds = array<i64: 64, 128>}, {pipeline_mode = #tpu.pipeline_mode<synchronous>, transform_indices = @transform_4, window_bounds = array<i64: 64, 1>}, {pipeline_mode = #tpu.pipeline_mode<synchronous>, transform_indices = @transform_5, window_bounds = array<i64: 32, 64>}, {pipeline_mode = #tpu.pipeline_mode<synchronous>, transform_indices = @transform_6, window_bounds = array<i64: 32, 1>}, {pipeline_mode = #tpu.pipeline_mode<synchronous>, transform_indices = @transform_7, window_bounds = array<i64: 8, 32>}, {pipeline_mode = #tpu.pipeline_mode<synchronous>, transform_indices = @transform_8, window_bounds = array<i64: 8, 1>}, {transform_indices = @transform_9, window_bounds = array<i64: 8, 128>}]} {
    %c0 = arith.constant 0 : index
    %c0_0 = arith.constant 0 : index
    %0 = vector.load %arg1[%c0, %c0_0] : memref<4x128xf32, #tpu.memory_space<vmem>>, vector<4x128xf32>
    %1 = arith.truncf %0 : vector<4x128xf32> to vector<4x128xbf16>
    %c0_1 = arith.constant 0 : index
    %c0_2 = arith.constant 0 : index
    %2 = vector.load %arg2[%c0_1, %c0_2] : memref<128x4xbf16, #tpu.memory_space<vmem>>, vector<128x4xbf16>
    %cst = arith.constant dense<0.000000e+00> : vector<128x128xf32>
    %3 = tpu.matmul %2, %1, %cst {dimension_numbers = #tpu.dot_dimension_numbers<[1], [0], [0], [1], [0, 0, 1, 1], [], []>} : vector<128x4xbf16>, vector<4x128xbf16>, vector<128x128xf32> -> vector<128x128xf32>
    %c0_3 = arith.constant 0 : index
    %c0_4 = arith.constant 0 : index
    %4 = vector.load %arg3[%c0_3, %c0_4] : memref<128x1xf32, #tpu.memory_space<vmem>>, vector<128x1xf32>
    %5 = vector.broadcast %4 : vector<128x1xf32> to vector<128x128xf32>
    %6 = arith.addf %3, %5 : vector<128x128xf32>
    %cst_5 = arith.constant 0.000000e+00 : f32
    %7 = vector.broadcast %cst_5 : f32 to vector<128x128xf32>
    %8 = arith.maximumf %6, %7 : vector<128x128xf32>
    %9 = arith.truncf %8 : vector<128x128xf32> to vector<128x128xbf16>
    %c0_6 = arith.constant 0 : index
    %c0_7 = arith.constant 0 : index
    %10 = vector.load %arg4[%c0_6, %c0_7] : memref<64x128xbf16, #tpu.memory_space<vmem>>, vector<64x128xbf16>
    %cst_8 = arith.constant dense<0.000000e+00> : vector<64x128xf32>
    %11 = tpu.matmul %10, %9, %cst_8 {dimension_numbers = #tpu.dot_dimension_numbers<[1], [0], [0], [1], [0, 0, 1, 1], [], []>} : vector<64x128xbf16>, vector<128x128xbf16>, vector<64x128xf32> -> vector<64x128xf32>
    %c0_9 = arith.constant 0 : index
    %c0_10 = arith.constant 0 : index
    %12 = vector.load %arg5[%c0_9, %c0_10] : memref<64x1xf32, #tpu.memory_space<vmem>>, vector<64x1xf32>
    %13 = vector.broadcast %12 : vector<64x1xf32> to vector<64x128xf32>
    %14 = arith.addf %11, %13 : vector<64x128xf32>
    %cst_11 = arith.constant 0.000000e+00 : f32
    %15 = vector.broadcast %cst_11 : f32 to vector<64x128xf32>
    %16 = arith.maximumf %14, %15 : vector<64x128xf32>
    %17 = arith.truncf %16 : vector<64x128xf32> to vector<64x128xbf16>
    %c0_12 = arith.constant 0 : index
    %c0_13 = arith.constant 0 : index
    %18 = vector.load %arg6[%c0_12, %c0_13] : memref<32x64xbf16, #tpu.memory_space<vmem>>, vector<32x64xbf16>
    %cst_14 = arith.constant dense<0.000000e+00> : vector<32x128xf32>
    %19 = tpu.matmul %18, %17, %cst_14 {dimension_numbers = #tpu.dot_dimension_numbers<[1], [0], [0], [1], [0, 0, 1, 1], [], []>} : vector<32x64xbf16>, vector<64x128xbf16>, vector<32x128xf32> -> vector<32x128xf32>
    %c0_15 = arith.constant 0 : index
    %c0_16 = arith.constant 0 : index
    %20 = vector.load %arg7[%c0_15, %c0_16] : memref<32x1xf32, #tpu.memory_space<vmem>>, vector<32x1xf32>
    %21 = vector.broadcast %20 : vector<32x1xf32> to vector<32x128xf32>
    %22 = arith.addf %19, %21 : vector<32x128xf32>
    %cst_17 = arith.constant 0.000000e+00 : f32
    %23 = vector.broadcast %cst_17 : f32 to vector<32x128xf32>
    %24 = arith.maximumf %22, %23 : vector<32x128xf32>
    %25 = arith.truncf %24 : vector<32x128xf32> to vector<32x128xbf16>
    %c0_18 = arith.constant 0 : index
    %c0_19 = arith.constant 0 : index
    %26 = vector.load %arg8[%c0_18, %c0_19] : memref<8x32xbf16, #tpu.memory_space<vmem>>, vector<8x32xbf16>
    %cst_20 = arith.constant dense<0.000000e+00> : vector<8x128xf32>
    %27 = tpu.matmul %26, %25, %cst_20 {dimension_numbers = #tpu.dot_dimension_numbers<[1], [0], [0], [1], [0, 0, 1, 1], [], []>} : vector<8x32xbf16>, vector<32x128xbf16>, vector<8x128xf32> -> vector<8x128xf32>
    %c0_21 = arith.constant 0 : index
    %c0_22 = arith.constant 0 : index
    %28 = vector.load %arg9[%c0_21, %c0_22] : memref<8x1xf32, #tpu.memory_space<vmem>>, vector<8x1xf32>
    %29 = vector.broadcast %28 : vector<8x1xf32> to vector<8x128xf32>
    %30 = arith.addf %27, %29 : vector<8x128xf32>
    %c0_23 = arith.constant 0 : index
    %c0_24 = arith.constant 0 : index
    %31 = vector.load %arg10[%c0_23, %c0_24] : memref<8x128xf32, #tpu.memory_space<vmem>>, vector<8x128xf32>
    tpu.vector_store %arg10[%c0_23, %c0_24], %30 {strides = array<i32>} : memref<8x128xf32, #tpu.memory_space<vmem>>, vector<8x128xf32>,
    return
  }
  func.func @transform_0(%arg0: i32) -> (i32, i32) {
    %c0_i32 = arith.constant 0 : i32
    %c0_i32_0 = arith.constant 0 : i32
    return %c0_i32, %arg0 : i32, i32
  }
  func.func @transform_1(%arg0: i32) -> (i32, i32) {
    %c0_i32 = arith.constant 0 : i32
    %c0_i32_0 = arith.constant 0 : i32
    %c0_i32_1 = arith.constant 0 : i32
    return %c0_i32, %c0_i32_0 : i32, i32
  }
  func.func @transform_2(%arg0: i32) -> (i32, i32) {
    %c0_i32 = arith.constant 0 : i32
    %c0_i32_0 = arith.constant 0 : i32
    %c0_i32_1 = arith.constant 0 : i32
    return %c0_i32, %c0_i32_0 : i32, i32
  }
  func.func @transform_3(%arg0: i32) -> (i32, i32) {
    %c0_i32 = arith.constant 0 : i32
    %c0_i32_0 = arith.constant 0 : i32
    %c0_i32_1 = arith.constant 0 : i32
    return %c0_i32, %c0_i32_0 : i32, i32
  }
  func.func @transform_4(%arg0: i32) -> (i32, i32) {
    %c0_i32 = arith.constant 0 : i32
    %c0_i32_0 = arith.constant 0 : i32
    %c0_i32_1 = arith.constant 0 : i32
    return %c0_i32, %c0_i32_0 : i32, i32
  }
  func.func @transform_5(%arg0: i32) -> (i32, i32) {
    %c0_i32 = arith.constant 0 : i32
    %c0_i32_0 = arith.constant 0 : i32
    %c0_i32_1 = arith.constant 0 : i32
    return %c0_i32, %c0_i32_0 : i32, i32
  }
  func.func @transform_6(%arg0: i32) -> (i32, i32) {
    %c0_i32 = arith.constant 0 : i32
    %c0_i32_0 = arith.constant 0 : i32
    %c0_i32_1 = arith.constant 0 : i32
    return %c0_i32, %c0_i32_0 : i32, i32
  }
  func.func @transform_7(%arg0: i32) -> (i32, i32) {
    %c0_i32 = arith.constant 0 : i32
    %c0_i32_0 = arith.constant 0 : i32
    %c0_i32_1 = arith.constant 0 : i32
    return %c0_i32, %c0_i32_0 : i32, i32
  }
  func.func @transform_8(%arg0: i32) -> (i32, i32) {
    %c0_i32 = arith.constant 0 : i32
    %c0_i32_0 = arith.constant 0 : i32
    %c0_i32_1 = arith.constant 0 : i32
    return %c0_i32, %c0_i32_0 : i32, i32
  }
  func.func @transform_9(%arg0: i32) -> (i32, i32) {
    %c0_i32 = arith.constant 0 : i32
    %c0_i32_0 = arith.constant 0 : i32
    return %c0_i32, %arg0 : i32, i32
  }
}

</mosaic_0001>

<bundles_post_ra>
// kernel: tpu_custom_call.1
= control target key start
LH: loop header
LB: loop body
LE: loop exit
PB: predicated region body
PF: predicated region fallthrough
CT: control target
= control target key end

     0   :  { %vm213_vm0 = vcmask 1041408   ;;  %vm188_vm1 = vcmask 31744   ;;  %v823_v6 = vmov 0   ;;  %s1034_s0 = inlined_call_operand.vmem [shape: f32[4,128], index: 0, kind: input, shape index: {}]   ;;  %s1035_s1 = inlined_call_operand.vmem [shape: bf16[128,4], index: 1, kind: input, shape index: {}]   ;;  %s1036_s2 = inlined_call_operand.vmem [shape: f32[128,1], index: 2, kind: input, shape index: {}]   ;;  %s1037_s3 = inlined_call_operand.vmem [shape: bf16[64,128], index: 3, kind: input, shape index: {}]   ;;  %s1038_s4 = inlined_call_operand.vmem [shape: f32[64,1], index: 4, kind: input, shape index: {}]   ;;  %s1039_s5 = inlined_call_operand.vmem [shape: bf16[32,64], index: 5, kind: input, shape index: {}]   ;;  %s1040_s6 = inlined_call_operand.vmem [shape: f32[32,1], index: 6, kind: input, shape index: {}]   ;;  %s1041_s7 = inlined_call_operand.vmem [shape: bf16[8,32], index: 7, kind: input, shape index: {}]   ;;  %s1042_s8 = inlined_call_operand.vmem [shape: f32[8,1], index: 8, kind: input, shape index: {}]   ;;  %s1043_s9 = inlined_call_operand.hbm [shape: f32[8,128], index: 9, kind: output, shape index: {}]  }
   0x1   :  { %v34_v0 = vld [vmem:[%s1034_s0] sm:$0xf]  ;;  %v786_v4 = vld [vmem:[%s1035_s1 + $0x8] sm:$0xff]   ;;  %v787_v5 = vld [vmem:[%s1035_s1 + $0x10] sm:$0xff]   ;;  %783 = vset.pattern.permute.xlu0 %v823_v6  ;;  %784 = vset.pattern.permute.xlu1 %v823_v6 }
   0x2   :  { %v785_v1 = vld [vmem:[%s1035_s1] sm:$0xff]   ;;  %v35_v2 = vpack.c.bf16 %v34_v0, %v34_v0  ;;  %v54_v8 = vld [vmem:[%s1036_s2 + $0x10] sm:$0xff]  ;;  %v53_v9 = vld [vmem:[%s1036_s2 + $0x8] sm:$0xff] }
   0x3   :  { %718 = vmatprep.mubr.msk.bf16.mxu0 %vm188_vm1, %v785_v1  ;;  %v52_v7 = vld [vmem:[%s1036_s2] sm:$0xff]  ;;  %80 = vperm.xlu1 %784, %v54_v8   ;;  %v788_v10 = vld [vmem:[%s1035_s1 + $0x18] sm:$0xff]   ;;  %v57_v14 = vld [vmem:[%s1036_s2 + $0x28] sm:$0xff] }
   0x4   :  { %778 = vmatprep.subr.msk.bf16.mxu0 %vm213_vm0, %v35_v2  ;;  %v215_v3 = vsel %vm213_vm0, %v35_v2, 0  ;;  %70 = vperm.xlu0 %783, %v52_v7   ;;  %v55_v11 = vld [vmem:[%s1036_s2 + $0x18] sm:$0xff]  ;;  %v789_v12 = vld [vmem:[%s1035_s1 + $0x20] sm:$0xff]   ;;  %v790_v15 = vld [vmem:[%s1035_s1 + $0x28] sm:$0xff]  }
   0x5   :  { %717 = vmatpush3.bf16.msra.mxu0 %v215_v3  ;;  %v56_v13 = vld [vmem:[%s1036_s2 + $0x20] sm:$0xff]  ;;  %v58_v16 = vld [vmem:[%s1036_s2 + $0x30] sm:$0xff]  ;;  %v59_v17 = vld [vmem:[%s1036_s2 + $0x38] sm:$0xff] }
   0x6   :  { %v791_v18 = vld [vmem:[%s1035_s1 + $0x30] sm:$0xff]   ;;  %v60_v19 = vld [vmem:[%s1036_s2 + $0x40] sm:$0xff] }
   0x7   :  { %85 = vperm.xlu1 %784, %v55_v11  }
   0x8   :  { %719 = vmatmul.mubr.msk.bf16.vlgmr.msra.gmra.mrb[0].mxu0 %vm188_vm1, %v786_v4  ;;  %75 = vperm.xlu0 %783, %v53_v9  }
   0x9   :  { %722 = vmatprep.mubr.msk.bf16.mxu0 %vm188_vm1, %v787_v5 }
   0xb   :  { %95 = vperm.xlu1 %784, %v57_v14  }
   0xc   :  { %90 = vperm.xlu0 %783, %v56_v13  }
   0xf   :  { %105 = vperm.xlu1 %784, %v59_v17  }
  0x10   :  { %723 = vmatmul.mubr.msk.bf16.gmra.mrb[4].mxu0 %vm188_vm1, %v788_v10  ;;  %100 = vperm.xlu0 %783, %v58_v16  }
  0x11   :  { %726 = vmatprep.mubr.msk.bf16.mxu0 %vm188_vm1, %v789_v12 }
  0x12   :  { %14 = vsyncpa [#allocation3], 0  ;;  %v61_v20 = vld [vmem:[%s1036_s2 + $0x48] sm:$0xff]  ;;  %v62_v21 = vld [vmem:[%s1036_s2 + $0x50] sm:$0xff]  ;;  %vm533_vm2 = vcmask 523264   ;;  %vm825_vm3 = vmmov 0  }
  0x13   :  { %115 = vperm.xlu1 %784, %v61_v20   ;;  %v792_v22 = vld [vmem:[%s1035_s1 + $0x38] sm:$0xff]   ;;  %v64_v24 = vld [vmem:[%s1036_s2 + $0x60] sm:$0xff]  ;;  %v65_v25 = vld [vmem:[%s1036_s2 + $0x68] sm:$0xff]  ;;  %vm602_vm4 = vcmask 261120   ;;  %s826_s23 = smov [#allocation2]  }
  0x14   :  { %110 = vperm.xlu0 %783, %v60_v19   ;;  %v63_v23 = vld [vmem:[%s1036_s2 + $0x58] sm:$0xff]  ;;  %v66_v26 = vld [vmem:[%s1036_s2 + $0x70] sm:$0xff]  ;;  %v346_v28 = vld [vmem:[%s1038_s4] sm:$0xff]  ;;  %s653_s24 = sshll.u32 %s826_s23, 4  ;;  %s654_s24 = int_to_ptr.vmem [resolvable:$true] %s653_s24 }
  0x15   :  { %v67_v27 = vld [vmem:[%s1036_s2 + $0x78] sm:$0xff]  ;;  %v347_v29 = vld [vmem:[%s1038_s4 + $0x8] sm:$0xff]  ;;  %v348_v30 = vld [vmem:[%s1038_s4 + $0x10] sm:$0xff]  ;;  %s799_s25 = scalar_lea.vmem %s654_s24, 128  ;;  %p804_p1 = scmp.lt.s32.totalorder %s654_s24, %s654_s24 }
  0x16   :  { %v349_v31 = vld [vmem:[%s1038_s4 + $0x18] sm:$0xff]  ;;  %v350_v32 = vld [vmem:[%s1038_s4 + $0x20] sm:$0xff]  ;;  %v351_v33 = vld [vmem:[%s1038_s4 + $0x28] sm:$0xff]  ;;  %p800_p0 = scmp.ne.s32.totalorder %s654_s24, %s799_s25  ;;  %p805_p2 = scmp.lt.s32.totalorder %s799_s25, %s799_s25 }
  0x17   :  { %125 = vperm.xlu1 %784, %v63_v23   ;;  %v352_v34 = vld [vmem:[%s1038_s4 + $0x30] sm:$0xff]  ;;  %v353_v35 = vld [vmem:[%s1038_s4 + $0x38] sm:$0xff]  ;;  %v499_v36 = vld [vmem:[%s1040_s6] sm:$0xff] }
  0x18   :  { %727 = vmatmul.mubr.msk.bf16.gmra.mrb[8].mxu0 %vm188_vm1, %v790_v15  ;;  %120 = vperm.xlu0 %783, %v62_v21   ;;  %v500_v37 = vld [vmem:[%s1040_s6 + $0x8] sm:$0xff]  ;;  %v501_v38 = vld [vmem:[%s1040_s6 + $0x10] sm:$0xff]  ;;  %v502_v39 = vld [vmem:[%s1040_s6 + $0x18] sm:$0xff]  ;;  %p806_p3 = por %p805_p2, %p804_p1 }
  0x19   :  { %730 = vmatprep.mubr.msk.bf16.mxu0 %vm188_vm1, %v791_v18  ;;  %v596_v40 = vld [vmem:[%s1042_s8] sm:$0xff] }
  0x1a   :  { %v793_v41 = vld [vmem:[%s1037_s3] sm:$0xff]   ;;  %p807_p4 = pnand %p806_p3, %p800_p0 }
  0x1b   :  { %135 = vperm.xlu1 %784, %v65_v25   ;;  %750 = vmatprep.mubr.bf16.mxu1 %v793_v41 }
  0x1c   :  { %130 = vperm.xlu0 %783, %v64_v24  }
  0x1f   :  { %145 = vperm.xlu1 %784, %v67_v27  }
  0x20   :  { %731 = vmatmul.mubr.msk.bf16.gmra.mrb[12].mxu0 %vm188_vm1, %v792_v22  ;;  %140 = vperm.xlu0 %783, %v66_v26  }
  0x23   :  { %361 = vperm.xlu1 %784, %v347_v29  }
  0x24   :  { %356 = vperm.xlu0 %783, %v346_v28  }
  0x27   :  { %371 = vperm.xlu1 %784, %v349_v31  }
  0x28   :  { %366 = vperm.xlu0 %783, %v348_v30  }
  0x2b   :  { %381 = vperm.xlu1 %784, %v351_v33  }
  0x2c   :  { %376 = vperm.xlu0 %783, %v350_v32  }
  0x2f   :  { %391 = vperm.xlu1 %784, %v353_v35  }
  0x30   :  { %386 = vperm.xlu0 %783, %v352_v34  }
  0x33   :  { %510 = vperm.xlu1 %784, %v500_v37  }
  0x34   :  { %505 = vperm.xlu0 %783, %v499_v36  }
  0x37   :  { %520 = vperm.xlu1 %784, %v502_v39  }
  0x38   :  { %515 = vperm.xlu0 %783, %v501_v38  }
  0x3c   :  { %599 = vperm.xlu0 %783, %v596_v40  }
  0x82   :  { %v81_v43 = vpop.permute.xlu1 %80 }
  0x83   :  { %v71_v42 = vpop.permute.xlu0 %70 }
  0x86   :  { %v86_v45 = vpop.permute.xlu1 %85 }
  0x87   :  { %v76_v44 = vpop.permute.xlu0 %75 }
  0x8a   :  { %v96_v47 = vpop.permute.xlu1 %95 }
  0x8b   :  { %v91_v46 = vpop.permute.xlu0 %90 }
  0x8e   :  { %v106_v52 = vpop.permute.xlu1 %105 }
  0x8f   :  { %v101_v48 = vpop.permute.xlu0 %100 }
  0x92   :  { %v116_v0 = vpop.permute.xlu1 %115 }
  0x93   :  { %v111_v60 = vpop.permute.xlu0 %110 }
  0x96   :  { %v126_v13 = vpop.permute.xlu1 %125 }
  0x97   :  { %v121_v9 = vpop.permute.xlu0 %120 }
  0x9a   :  { %v136_v26 = vpop.permute.xlu1 %135 }
  0x9b   :  { %v131_v21 = vpop.permute.xlu0 %130 }
  0x9e   :  { %v146_v38 = vpop.permute.xlu1 %145 }
  0x9f   :  { %v141_v33 = vpop.permute.xlu0 %140 }
  0xdb   :  { %v720_v49 = vpop.f32.mrb[0].mxu0 }
  0xdc   :  { %v260_v50 = vadd.f32 %v720_v49, %v81_v43  ;;  %v251_v51 = vpop.f32.mrb[1].mxu0 }
  0xdd   :  { %v252_v53 = vadd.f32 %v251_v51, %v71_v42  ;;  %v721_v54 = vpop.f32.mrb[2].mxu0  ;;  %v795_v51 = vld [vmem:[%s1037_s3 + $0x10] sm:$0xff]  }
  0xde   :  { %v263_v55 = vadd.f32 %v721_v54, %v86_v45  ;;  %v254_v56 = vpop.f32.mrb[3].mxu0  ;;  %v316_v58 = vmax.f32 %v260_v50, 0.0  ;;  %v794_v50 = vld [vmem:[%s1037_s3 + $0x8] sm:$0xff]   ;;  %v357_v54 = vpop.permute.xlu0 %356 }
  0xdf   :  { %v255_v57 = vadd.f32 %v254_v56, %v76_v44  ;;  %v314_v61 = vmax.f32 %v252_v53, 0.0  ;;  %v797_v53 = vld [vmem:[%s1039_s5] sm:$0xff]  }
  0xe0   :  { %v317_v59 = vmax.f32 %v263_v55, 0.0  ;;  %766 = vmatprep.mubr.msk.bf16.mxu0 %vm533_vm2, %v797_v53  ;;  %v362_v55 = vpop.permute.xlu1 %361 }
  0xe1   :  { %v315_v62 = vmax.f32 %v255_v57, 0.0 }
  0xe2   :  { %v331_v63 = vpack.c.bf16 %v317_v59, %v316_v58  ;;  %v367_v56 = vpop.permute.xlu0 %366 }
  0xe3   :  { %v724_v1 = vpop.f32.mrb[4].mxu0  ;;  %v330_v2 = vpack.c.bf16 %v315_v62, %v314_v61 }
  0xe4   :  { %v276_v3 = vadd.f32 %v724_v1, %v101_v48  ;;  %v267_v4 = vpop.f32.mrb[5].mxu0  ;;  %v372_v57 = vpop.permute.xlu1 %371 }
  0xe5   :  { %v268_v5 = vadd.f32 %v267_v4, %v91_v46  ;;  %v725_v6 = vpop.f32.mrb[6].mxu0  ;;  %734 = vmatprep.subr.bf16.mxu1 %v330_v2 }
  0xe6   :  { %v279_v7 = vadd.f32 %v725_v6, %v106_v52  ;;  %v270_v8 = vpop.f32.mrb[7].mxu0  ;;  %735 = vmatpush3.bf16.msra.mxu1 %v330_v2  ;;  %v320_v11 = vmax.f32 %v276_v3, 0.0  ;;  %v796_v52 = vld [vmem:[%s1037_s3 + $0x18] sm:$0xff]   ;;  %v377_v61 = vpop.permute.xlu0 %376 }
  0xe7   :  { %v271_v10 = vadd.f32 %v270_v8, %v96_v47  ;;  %736 = vmatprep.subr.bf16.mxu1 %v331_v63  ;;  %v318_v14 = vmax.f32 %v268_v5, 0.0 }
  0xe8   :  { %v321_v12 = vmax.f32 %v279_v7, 0.0  ;;  %v382_v2 = vpop.permute.xlu1 %381 }
  0xe9   :  { %v319_v15 = vmax.f32 %v271_v10, 0.0 }
  0xea   :  { %v333_v16 = vpack.c.bf16 %v321_v12, %v320_v11  ;;  %737 = vmatpush3.bf16.msra.mxu1 %v331_v63 }
  0xeb   :  { %v332_v17 = vpack.c.bf16 %v319_v15, %v318_v14  ;;  %v728_v18 = vpop.f32.mrb[8].mxu0 }
  0xec   :  { %v292_v19 = vadd.f32 %v728_v18, %v121_v9  ;;  %v283_v20 = vpop.f32.mrb[9].mxu0  ;;  %v387_v9 = vpop.permute.xlu0 %386 }
  0xed   :  { %v284_v22 = vadd.f32 %v283_v20, %v111_v60  ;;  %v729_v23 = vpop.f32.mrb[10].mxu0  ;;  %738 = vmatprep.subr.bf16.mxu1 %v332_v17  ;;  %v392_v14 = vpop.permute.xlu1 %391 }
  0xee   :  { %v295_v24 = vadd.f32 %v729_v23, %v126_v13  ;;  %v286_v25 = vpop.f32.mrb[11].mxu0  ;;  %739 = vmatpush3.bf16.msra.mxu1 %v332_v17  ;;  %v324_v28 = vmax.f32 %v292_v19, 0.0 }
  0xef   :  { %v287_v27 = vadd.f32 %v286_v25, %v116_v0  ;;  %740 = vmatprep.subr.bf16.mxu1 %v333_v16  ;;  %v322_v30 = vmax.f32 %v284_v22, 0.0 }
  0xf0   :  { %v325_v29 = vmax.f32 %v295_v24, 0.0 }
  0xf1   :  { %v323_v31 = vmax.f32 %v287_v27, 0.0  ;;  %v824_v27 = vmov 0.0  }
  0xf2   :  { %v335_v32 = vpack.c.bf16 %v325_v29, %v324_v28  ;;  %741 = vmatpush3.bf16.msra.mxu1 %v333_v16  ;;  %v506_v28 = vpop.permute.xlu0 %505  ;;  %v511_v29 = vpop.permute.xlu1 %510 }
  0xf3   :  { %v334_v34 = vpack.c.bf16 %v323_v31, %v322_v30  ;;  %v732_v35 = vpop.f32.mrb[12].mxu0 }
  0xf4   :  { %v308_v36 = vadd.f32 %v732_v35, %v141_v33  ;;  %v299_v37 = vpop.f32.mrb[13].mxu0 }
  0xf5   :  { %v300_v39 = vadd.f32 %v299_v37, %v131_v21  ;;  %v733_v40 = vpop.f32.mrb[14].mxu0  ;;  %742 = vmatprep.subr.bf16.mxu1 %v334_v34 }
  0xf6   :  { %v311_v41 = vadd.f32 %v733_v40, %v146_v38  ;;  %v302_v42 = vpop.f32.mrb[15].mxu0  ;;  %743 = vmatpush3.bf16.msra.mxu1 %v334_v34  ;;  %v328_v44 = vmax.f32 %v308_v36, 0.0  ;;  %v516_v30 = vpop.permute.xlu0 %515 }
  0xf7   :  { %v303_v43 = vadd.f32 %v302_v42, %v136_v26  ;;  %744 = vmatprep.subr.bf16.mxu1 %v335_v32  ;;  %v326_v46 = vmax.f32 %v300_v39, 0.0  ;;  %v798_v26 = vld [vmem:[%s1039_s5 + $0x8] sm:$0xff]   ;;  %v521_v34 = vpop.permute.xlu1 %520 }
  0xf8   :  { %v329_v45 = vmax.f32 %v311_v41, 0.0 }
  0xf9   :  { %v327_v47 = vmax.f32 %v303_v43, 0.0 }
  0xfa   :  { %v337_v48 = vpack.c.bf16 %v329_v45, %v328_v44  ;;  %745 = vmatpush3.bf16.msra.mxu1 %v335_v32 }
  0xfb   :  { %v336_v49 = vpack.c.bf16 %v327_v47, %v326_v46  ;;  %v595_v46 = vld [vmem:[%s1041_s7] sm:$0xf]  ;;  %v600_v47 = vpop.permute.xlu0 %599 }
  0xfd   :  { %746 = vmatprep.subr.bf16.mxu1 %v336_v49 }
  0xfe   :  { %747 = vmatpush3.bf16.msra.mxu1 %v336_v49 }
  0xff   :  { %748 = vmatprep.subr.bf16.mxu1 %v337_v48 }
 0x102   :  { %749 = vmatpush3.bf16.msra.mxu1 %v337_v48 }
 0x105   :  { %751 = vmatmul.mubr.bf16.vlgmr.msra.gmra.mrb[0].mxu1 %v794_v50 }
 0x106   :  { %754 = vmatprep.mubr.bf16.mxu1 %v795_v51 }
 0x10d   :  { %755 = vmatmul.mubr.bf16.gmra.mrb[4].mxu1 %v796_v52 }
 0x1d8   :  { %v752_v58 = vpop.f32.mrb[0].mxu1 }
 0x1d9   :  { %v461_v59 = vadd.f32 %v752_v58, %v367_v56  ;;  %v452_v60 = vpop.f32.mrb[1].mxu1 }
 0x1da   :  { %v453_v62 = vadd.f32 %v452_v60, %v357_v54  ;;  %v753_v63 = vpop.f32.mrb[2].mxu1 }
 0x1db   :  { %v464_v0 = vadd.f32 %v753_v63, %v372_v57  ;;  %v455_v1 = vpop.f32.mrb[3].mxu1  ;;  %v485_v4 = vmax.f32 %v461_v59, 0.0 }
 0x1dc   :  { %v456_v3 = vadd.f32 %v455_v1, %v362_v55  ;;  %v483_v6 = vmax.f32 %v453_v62, 0.0 }
 0x1dd   :  { %v486_v5 = vmax.f32 %v464_v0, 0.0 }
 0x1de   :  { %v484_v7 = vmax.f32 %v456_v3, 0.0 }
 0x1df   :  { %v492_v8 = vpack.c.bf16 %v486_v5, %v485_v4 }
 0x1e0   :  { %v491_v10 = vpack.c.bf16 %v484_v7, %v483_v6  ;;  %v756_v11 = vpop.f32.mrb[4].mxu1 }
 0x1e1   :  { %v477_v12 = vadd.f32 %v756_v11, %v387_v9  ;;  %v468_v13 = vpop.f32.mrb[5].mxu1 }
 0x1e2   :  { %v469_v15 = vadd.f32 %v468_v13, %v377_v61  ;;  %v757_v16 = vpop.f32.mrb[6].mxu1  ;;  %758 = vmatprep.subr.bf16.mxu0 %v491_v10 }
 0x1e3   :  { %v480_v17 = vadd.f32 %v757_v16, %v392_v14  ;;  %v471_v18 = vpop.f32.mrb[7].mxu1  ;;  %759 = vmatpush3.bf16.msra.mxu0 %v491_v10  ;;  %v489_v20 = vmax.f32 %v477_v12, 0.0 }
 0x1e4   :  { %v472_v19 = vadd.f32 %v471_v18, %v382_v2  ;;  %760 = vmatprep.subr.bf16.mxu0 %v492_v8  ;;  %v487_v22 = vmax.f32 %v469_v15, 0.0 }
 0x1e5   :  { %v490_v21 = vmax.f32 %v480_v17, 0.0 }
 0x1e6   :  { %v488_v23 = vmax.f32 %v472_v19, 0.0 }
 0x1e7   :  { %v494_v24 = vpack.c.bf16 %v490_v21, %v489_v20  ;;  %761 = vmatpush3.bf16.msra.mxu0 %v492_v8 }
 0x1e8   :  { %v493_v25 = vpack.c.bf16 %v488_v23, %v487_v22 }
 0x1ea   :  { %762 = vmatprep.subr.bf16.mxu0 %v493_v25 }
 0x1eb   :  { %763 = vmatpush3.bf16.msra.mxu0 %v493_v25 }
 0x1ec   :  { %764 = vmatprep.subr.bf16.mxu0 %v494_v24 }
 0x1ef   :  { %765 = vmatpush3.bf16.msra.mxu0 %v494_v24 }
 0x1f0   :  { %770 = vmatprep.subr.bf16.mxu0 %v824_v27 }
 0x1f2   :  { %767 = vmatmul.mubr.msk.bf16.vlgmr.msra.gmra.mrb[16].mxu0 %vm533_vm2, %v798_v26 }
 0x1f3   :  { %774 = vmatprep.mubr.msk.bf16.mxu0 %vm825_vm3, %v824_v27 }
 0x2c5   :  { %v768_v31 = vpop.f32.mrb[16].mxu0 }
 0x2c6   :  { %v583_v32 = vadd.f32 %v768_v31, %v516_v30  ;;  %v574_v33 = vpop.f32.mrb[17].mxu0 }
 0x2c7   :  { %v575_v35 = vadd.f32 %v574_v33, %v506_v28  ;;  %v769_v36 = vpop.f32.mrb[18].mxu0 }
 0x2c8   :  { %v586_v37 = vadd.f32 %v769_v36, %v521_v34  ;;  %v577_v38 = vpop.f32.mrb[19].mxu0  ;;  %v591_v40 = vmax.f32 %v583_v32, 0.0 }
 0x2c9   :  { %v578_v39 = vadd.f32 %v577_v38, %v511_v29  ;;  %v589_v42 = vmax.f32 %v575_v35, 0.0 }
 0x2ca   :  { %v592_v41 = vmax.f32 %v586_v37, 0.0 }
 0x2cb   :  { %v590_v43 = vmax.f32 %v578_v39, 0.0 }
 0x2cc   :  { %v594_v44 = vpack.c.bf16 %v592_v41, %v591_v40 }
 0x2cd   :  { %v593_v45 = vpack.c.bf16 %v590_v43, %v589_v42 }
 0x2cf   :  { %771 = vmatpush3.bf16.msra.mxu0 %v593_v45 }
 0x2d0   :  { %772 = vmatprep.subr.bf16.mxu0 %v824_v27 }
 0x2d3   :  { %773 = vmatpush3.bf16.msra.mxu0 %v594_v44 }
 0x2d6   :  { %775 = vmatmul.mubr.msk.bf16.vlgmr.msra.gmra.mrb[20].mxu0 %vm602_vm4, %v595_v46 }
 0x3a9   :  { %v640_v48 = vpop.f32.mrb[20].mxu0 }
 0x3aa   :  { %v641_v49 = vadd.f32 %v640_v48, %v600_v47  ;;  %v776_v50 = vpop.f32.mrb[21].mxu0 }
 0x3ab   :  { %v643_v51 = vpop.f32.mrb[22].mxu0 }
 0x3ac   :  { %646 = vst [vmem:[#allocation2] sm:$0xff] %v641_v49  ;;  %v777_v52 = vpop.f32.mrb[23].mxu0 }
 0x3ad   :  { %810 = shalt.err (!%p807_p4)
}
 0x3ae   :  { %s811_s27 = scalar_lea.hbm %s1043_s9, 128 }
 0x3af   :  { %p812_p5 = scmp.ne.s32.totalorder %s1043_s9, %s811_s27  ;;  %p815_p6 = scmp.lt.u32.totalorder %s811_s27, %s1043_s9 }
 0x3b1   :  { %p817_p7 = pnand %p815_p6, %p812_p5 }
 0x3b3   :  { %820 = shalt.err (!%p817_p7)
}
 0x3b4   :  { %656 = dma.vmem_to_hbm [thread:$0]  %s654_s24, 128, %s1043_s9, [#allocation3]  }
 0x3b5   :  { %821 = dma.done.wait [#allocation3], 128  }
 0x3b6   :  { %822 = vsyncadd [#allocation3], 4294967168 }
 0x3b7   :  { %660 = vsyncpa [#allocation3], 1 }

</bundles_post_ra>
